<compile_context>
chip_gen: v5e
topology: v5e:2x2
jax: 0.10.0
libtpu: 0.0.40
codegen_flags: <defaults>
</compile_context>

<pallas_src>
import functools

import jax
import jax.numpy as jnp
from jax.experimental import pallas as pl
from jax.experimental.pallas import tpu as pltpu


_NONLINEARITIES = {
    "tanh": jnp.tanh,
    "relu": jax.nn.relu,
    "sigmoid": jax.nn.sigmoid,
    "softplus": jax.nn.softplus,
    "selu": jax.nn.selu,
    "elu": jax.nn.elu,
    "swish": lambda x: x * jax.nn.sigmoid(x),
}


def _round_up(x, m):
    return ((x + m - 1) // m) * m


def _pad2(a, rows, cols, dtype=None):
    if dtype is not None:
        a = a.astype(dtype)
    return jnp.pad(a, ((0, rows - a.shape[0]), (0, cols - a.shape[1])))


def _mlp_kernel(x_ref, w1_ref, b1_ref, w2_ref, b2_ref, w3_ref, o_ref, *, nl):
    # Fully fused forward pass in VMEM: 3 MXU matmuls (f32 accumulate) +
    # f32 bias adds + f32 nonlinearities (EUP/VPU), one lane-dense store.
    cdt = w1_ref.dtype  # matmul operand dtype (bf16 by default)
    h = nl(
        jnp.dot(x_ref[...], w1_ref[...], preferred_element_type=jnp.float32)
        + b1_ref[...]
    )
    h = nl(
        jnp.dot(h.astype(cdt), w2_ref[...], preferred_element_type=jnp.float32)
        + b2_ref[...]
    )
    y = jnp.dot(h.astype(cdt), w3_ref[...], preferred_element_type=jnp.float32)
    o_ref[...] = y.astype(o_ref.dtype)


@functools.partial(
    jax.jit, static_argnames=("block_b", "nonlinearity", "compute_dtype")
)
def mlp_forward(x, w1, b1, w2, b2, w3, *, block_b=None,
                nonlinearity="tanh", compute_dtype=jnp.bfloat16):
    """x: (B, D_in); w*: (in, out) [pre-transposed]; b*: (1, hidden).

    Returns (B, D_out) in x.dtype.
    """
    B, d_in = x.shape
    hidden = w1.shape[1]
    d_out = w3.shape[1]
    out_dtype = x.dtype

    # Lane-dense padded feature dims (no-ops when already multiples of 128).
    d_in_p = _round_up(d_in, 128)
    hid_p = _round_up(hidden, 128)
    d_out_p = _round_up(d_out, 128)

    # Batch tiling: multiple of 8 sublanes; default 256 rows/tile so realistic
    # batches get a multi-step pipelined (and megacore-shardable) grid.
    if block_b is None:
        block_b = min(256, _round_up(B, 8))
    block_b = _round_up(block_b, 8)
    b_pad = _round_up(B, block_b)          # never drop remainder rows
    grid = (b_pad // block_b,)

    cdt = jnp.dtype(compute_dtype)
    xp = _pad2(x, b_pad, d_in_p, cdt)
    w1p = _pad2(w1, d_in_p, hid_p, cdt)
    w2p = _pad2(w2, hid_p, hid_p, cdt)
    w3p = _pad2(w3, hid_p, d_out_p, cdt)
    b1p = _pad2(b1, 1, hid_p, jnp.float32)
    b2p = _pad2(b2, 1, hid_p, jnp.float32)

    # Advisory cost estimate for the XLA scheduler.
    flops = 2 * b_pad * (d_in_p * hid_p + hid_p * hid_p + hid_p * d_out_p)
    transcendentals = 2 * b_pad * hid_p
    bytes_accessed = int(
        xp.size * cdt.itemsize
        + (w1p.size + w2p.size + w3p.size) * cdt.itemsize
        + (b1p.size + b2p.size) * 4
        + b_pad * d_out_p * jnp.dtype(out_dtype).itemsize
    )

    # Explicit VMEM budget: double-buffered x/out tiles, resident weights and
    # biases, f32 intermediates, plus headroom. Clamped so the limit is valid
    # on v7x (64 MiB physical VMEM) as well as v5e/v6e (128 MiB).
    weight_bytes = (w1p.size + w2p.size + w3p.size) * cdt.itemsize
    vmem_needed = int(
        2 * block_b * d_in_p * cdt.itemsize
        + 2 * block_b * d_out_p * jnp.dtype(out_dtype).itemsize
        + 2 * weight_bytes
        + 2 * (b1p.size + b2p.size) * 4
        + 4 * block_b * hid_p * 4
    )
    vmem_limit = max(8 << 20, min(int(1.5 * vmem_needed), 48 << 20))

    kernel = functools.partial(_mlp_kernel, nl=_NONLINEARITIES[nonlinearity])

    out = pl.pallas_call(
        kernel,
        out_shape=jax.ShapeDtypeStruct((b_pad, d_out_p), out_dtype),
        grid=grid,
        in_specs=[
            pl.BlockSpec((block_b, d_in_p), lambda i: (i, 0)),  # x (batch-tiled)
            pl.BlockSpec((d_in_p, hid_p), lambda i: (0, 0)),    # W1 (resident)
            pl.BlockSpec((1, hid_p), lambda i: (0, 0)),         # b1 (resident, f32)
            pl.BlockSpec((hid_p, hid_p), lambda i: (0, 0)),     # W2 (resident)
            pl.BlockSpec((1, hid_p), lambda i: (0, 0)),         # b2 (resident, f32)
            pl.BlockSpec((hid_p, d_out_p), lambda i: (0, 0)),   # W3 (resident)
        ],
        out_specs=pl.BlockSpec((block_b, d_out_p), lambda i: (i, 0)),
        compiler_params=pltpu.CompilerParams(
            dimension_semantics=("parallel",),
            vmem_limit_bytes=vmem_limit,
        ),
        cost_estimate=pl.CostEstimate(
            flops=flops,
            transcendentals=transcendentals,
            bytes_accessed=bytes_accessed,
        ),
    )(xp, w1p, b1p, w2p, b2p, w3p)

    return out[:B, :d_out]


def _orthogonal(key, rows, cols, dtype=jnp.float32):
    """Deterministic orthogonal init matching torch.nn.init.orthogonal_."""
    n, m = max(rows, cols), min(rows, cols)
    a = jax.random.normal(key, (n, m), dtype=jnp.float32)
    q, r = jnp.linalg.qr(a)
    q = q * jnp.sign(jnp.diag(r))[None, :]
    w = q if rows >= cols else q.T
    return w.astype(dtype)


def init_mlp_params(key, input_dim, hidden_dim, output_dim):
    k1, k2, k3 = jax.random.split(key, 3)
    # PyTorch Linear weight is (out, in); we store transposed (in, out).
    w1 = _orthogonal(k1, hidden_dim, input_dim).T    # (input_dim, hidden_dim)
    w2 = _orthogonal(k2, hidden_dim, hidden_dim).T   # (hidden_dim, hidden_dim)
    w3 = _orthogonal(k3, output_dim, hidden_dim).T   # (hidden_dim, output_dim)
    b1 = jnp.linspace(-0.1, 0.1, hidden_dim, dtype=jnp.float32).reshape(1, hidden_dim)
    b2 = jnp.linspace(0.1, -0.1, hidden_dim, dtype=jnp.float32).reshape(1, hidden_dim)
    return w1, b1, w2, b2, w3


def mlp_reference(x, w1, b1, w2, b2, w3):
    h = jnp.tanh(x @ w1 + b1)
    h = jnp.tanh(h @ w2 + b2)
    return h @ w3


if __name__ == "__main__":
    key = jax.random.PRNGKey(0)
    kx, kp = jax.random.split(key)

    batch, input_dim, hidden_dim, output_dim = 8, 4, 32, 2

    x = jax.random.normal(kx, (batch, input_dim), dtype=jnp.float32)
    w1, b1, w2, b2, w3 = init_mlp_params(kp, input_dim, hidden_dim, output_dim)
    y_ref = mlp_reference(x, w1, b1, w2, b2, w3)

    # Default (performance) path: bf16 MXU operands, f32 accumulation.
    y_bf16 = jax.block_until_ready(mlp_forward(x, w1, b1, w2, b2, w3))
    assert y_bf16.shape == (batch, output_dim)
    assert jnp.allclose(y_bf16, y_ref, atol=5e-2, rtol=5e-2), "bf16 path mismatch"

    # All-f32 path: tight numerical check of the fused kernel math / padding.
    y_f32 = jax.block_until_ready(
        mlp_forward(x, w1, b1, w2, b2, w3, compute_dtype=jnp.float32)
    )
    assert y_f32.shape == (batch, output_dim)
    assert jnp.allclose(y_f32, y_ref, atol=1e-4, rtol=1e-4), "f32 path mismatch"

    print("KERNEL_OK")
</pallas_src>

<mosaic_0001>
module attributes {stable_mosaic.version = 11 : i64} {
  func.func @_mlp_kernel(%arg0: i32, %arg1: memref<8x128xbf16, #tpu.memory_space<vmem>>, %arg2: memref<128x128xbf16, #tpu.memory_space<vmem>>, %arg3: memref<1x128xf32, #tpu.memory_space<vmem>>, %arg4: memref<128x128xbf16, #tpu.memory_space<vmem>>, %arg5: memref<1x128xf32, #tpu.memory_space<vmem>>, %arg6: memref<128x128xbf16, #tpu.memory_space<vmem>>, %arg7: memref<8x128xf32, #tpu.memory_space<vmem>>) attributes {dimension_semantics = [#tpu.dimension_semantics<parallel>], iteration_bounds = array<i64: 1>, scalar_prefetch = 0 : i64, scratch_operands = 0 : i64, tpu.core_type = #tpu.core_type<tc>, window_params = [{transform_indices = @transform_0, window_bounds = array<i64: 8, 128>}, {pipeline_mode = #tpu.pipeline_mode<synchronous>, transform_indices = @transform_1, window_bounds = array<i64: 128, 128>}, {pipeline_mode = #tpu.pipeline_mode<synchronous>, transform_indices = @transform_2, window_bounds = array<i64: 1, 128>}, {pipeline_mode = #tpu.pipeline_mode<synchronous>, transform_indices = @transform_3, window_bounds = array<i64: 128, 128>}, {pipeline_mode = #tpu.pipeline_mode<synchronous>, transform_indices = @transform_4, window_bounds = array<i64: 1, 128>}, {pipeline_mode = #tpu.pipeline_mode<synchronous>, transform_indices = @transform_5, window_bounds = array<i64: 128, 128>}, {transform_indices = @transform_6, window_bounds = array<i64: 8, 128>}]} {
    %c0 = arith.constant 0 : index
    %c0_0 = arith.constant 0 : index
    %0 = vector.load %arg1[%c0, %c0_0] : memref<8x128xbf16, #tpu.memory_space<vmem>>, vector<8x128xbf16>
    %c0_1 = arith.constant 0 : index
    %c0_2 = arith.constant 0 : index
    %1 = vector.load %arg2[%c0_1, %c0_2] : memref<128x128xbf16, #tpu.memory_space<vmem>>, vector<128x128xbf16>
    %cst = arith.constant dense<0.000000e+00> : vector<8x128xf32>
    %2 = tpu.matmul %0, %1, %cst {dimension_numbers = #tpu.dot_dimension_numbers<[1], [0], [0], [1], [0, 0, 1, 1], [], []>} : vector<8x128xbf16>, vector<128x128xbf16>, vector<8x128xf32> -> vector<8x128xf32>
    %c0_3 = arith.constant 0 : index
    %c0_4 = arith.constant 0 : index
    %3 = vector.load %arg3[%c0_3, %c0_4] : memref<1x128xf32, #tpu.memory_space<vmem>>, vector<1x128xf32>
    %4 = vector.broadcast %3 : vector<1x128xf32> to vector<8x128xf32>
    %5 = arith.addf %2, %4 : vector<8x128xf32>
    %6 = math.tanh %5 : vector<8x128xf32>
    %7 = arith.truncf %6 : vector<8x128xf32> to vector<8x128xbf16>
    %c0_5 = arith.constant 0 : index
    %c0_6 = arith.constant 0 : index
    %8 = vector.load %arg4[%c0_5, %c0_6] : memref<128x128xbf16, #tpu.memory_space<vmem>>, vector<128x128xbf16>
    %cst_7 = arith.constant dense<0.000000e+00> : vector<8x128xf32>
    %9 = tpu.matmul %7, %8, %cst_7 {dimension_numbers = #tpu.dot_dimension_numbers<[1], [0], [0], [1], [0, 0, 1, 1], [], []>} : vector<8x128xbf16>, vector<128x128xbf16>, vector<8x128xf32> -> vector<8x128xf32>
    %c0_8 = arith.constant 0 : index
    %c0_9 = arith.constant 0 : index
    %10 = vector.load %arg5[%c0_8, %c0_9] : memref<1x128xf32, #tpu.memory_space<vmem>>, vector<1x128xf32>
    %11 = vector.broadcast %10 : vector<1x128xf32> to vector<8x128xf32>
    %12 = arith.addf %9, %11 : vector<8x128xf32>
    %13 = math.tanh %12 : vector<8x128xf32>
    %14 = arith.truncf %13 : vector<8x128xf32> to vector<8x128xbf16>
    %c0_10 = arith.constant 0 : index
    %c0_11 = arith.constant 0 : index
    %15 = vector.load %arg6[%c0_10, %c0_11] : memref<128x128xbf16, #tpu.memory_space<vmem>>, vector<128x128xbf16>
    %cst_12 = arith.constant dense<0.000000e+00> : vector<8x128xf32>
    %16 = tpu.matmul %14, %15, %cst_12 {dimension_numbers = #tpu.dot_dimension_numbers<[1], [0], [0], [1], [0, 0, 1, 1], [], []>} : vector<8x128xbf16>, vector<128x128xbf16>, vector<8x128xf32> -> vector<8x128xf32>
    %c0_13 = arith.constant 0 : index
    %c0_14 = arith.constant 0 : index
    %17 = vector.load %arg7[%c0_13, %c0_14] : memref<8x128xf32, #tpu.memory_space<vmem>>, vector<8x128xf32>
    tpu.vector_store %arg7[%c0_13, %c0_14], %16 {strides = array<i32>} : memref<8x128xf32, #tpu.memory_space<vmem>>, vector<8x128xf32>,
    return
  }
  func.func @transform_0(%arg0: i32) -> (i32, i32) {
    %c0_i32 = arith.constant 0 : i32
    %c0_i32_0 = arith.constant 0 : i32
    return %arg0, %c0_i32 : i32, i32
  }
  func.func @transform_1(%arg0: i32) -> (i32, i32) {
    %c0_i32 = arith.constant 0 : i32
    %c0_i32_0 = arith.constant 0 : i32
    %c0_i32_1 = arith.constant 0 : i32
    return %c0_i32, %c0_i32_0 : i32, i32
  }
  func.func @transform_2(%arg0: i32) -> (i32, i32) {
    %c0_i32 = arith.constant 0 : i32
    %c0_i32_0 = arith.constant 0 : i32
    %c0_i32_1 = arith.constant 0 : i32
    return %c0_i32, %c0_i32_0 : i32, i32
  }
  func.func @transform_3(%arg0: i32) -> (i32, i32) {
    %c0_i32 = arith.constant 0 : i32
    %c0_i32_0 = arith.constant 0 : i32
    %c0_i32_1 = arith.constant 0 : i32
    return %c0_i32, %c0_i32_0 : i32, i32
  }
  func.func @transform_4(%arg0: i32) -> (i32, i32) {
    %c0_i32 = arith.constant 0 : i32
    %c0_i32_0 = arith.constant 0 : i32
    %c0_i32_1 = arith.constant 0 : i32
    return %c0_i32, %c0_i32_0 : i32, i32
  }
  func.func @transform_5(%arg0: i32) -> (i32, i32) {
    %c0_i32 = arith.constant 0 : i32
    %c0_i32_0 = arith.constant 0 : i32
    %c0_i32_1 = arith.constant 0 : i32
    return %c0_i32, %c0_i32_0 : i32, i32
  }
  func.func @transform_6(%arg0: i32) -> (i32, i32) {
    %c0_i32 = arith.constant 0 : i32
    %c0_i32_0 = arith.constant 0 : i32
    return %arg0, %c0_i32 : i32, i32
  }
}

</mosaic_0001>

<bundles_post_ra>
// kernel: mlp_forward.1
= control target key start
LH: loop header
LB: loop body
LE: loop exit
PB: predicated region body
PF: predicated region fallthrough
CT: control target
= control target key end

     0   :  { %s517_s1 = inlined_call_operand.vmem [shape: bf16[128,128], index: 1, kind: input, shape index: {}]   ;;  %s518_s3 = inlined_call_operand.vmem [shape: bf16[128,128], index: 3, kind: input, shape index: {}]   ;;  %s519_s2 = inlined_call_operand.vmem [shape: f32[1,128], index: 2, kind: input, shape index: {}]   ;;  %s520_s0 = inlined_call_operand.vmem [shape: bf16[8,128], index: 0, kind: input, shape index: {}]   ;;  %s521_s4 = inlined_call_operand.vmem [shape: f32[1,128], index: 4, kind: input, shape index: {}]   ;;  %s522_s5 = inlined_call_operand.vmem [shape: bf16[128,128], index: 5, kind: input, shape index: {}]   ;;  %s523_s6 = inlined_call_operand.vmem [shape: f32[8,128], index: 6, kind: output, shape index: {}]  }
   0x1   :  { %v375_v0 = vld [vmem:[%s517_s1 + $0x38] sm:$0xff]  ;;  %v374_v1 = vld [vmem:[%s517_s1 + $0x30] sm:$0xff]  ;;  %v373_v4 = vld [vmem:[%s517_s1 + $0x28] sm:$0xff] }
   0x2   :  { %92 = vmatpush.bf16.msra.mxu0 %v375_v0  ;;  %v383_v2 = vld [vmem:[%s518_s3 + $0x38] sm:$0xff]  ;;  %v382_v3 = vld [vmem:[%s518_s3 + $0x30] sm:$0xff]  ;;  %v381_v5 = vld [vmem:[%s518_s3 + $0x28] sm:$0xff] }
   0x3   :  { %175 = vmatpush.bf16.msra.mxu1 %v383_v2  ;;  %v372_v6 = vld [vmem:[%s517_s1 + $0x20] sm:$0xff]  ;;  %v371_v8 = vld [vmem:[%s517_s1 + $0x18] sm:$0xff]  ;;  %v370_v10 = vld [vmem:[%s517_s1 + $0x10] sm:$0xff] }
   0x4   :  { %v380_v7 = vld [vmem:[%s518_s3 + $0x20] sm:$0xff]  ;;  %v379_v9 = vld [vmem:[%s518_s3 + $0x18] sm:$0xff]  ;;  %v369_v11 = vld [vmem:[%s517_s1 + $0x8] sm:$0xff] }
   0x5   :  { %v368_v12 = vld [vmem:[%s517_s1] sm:$0xff]  ;;  %v378_v14 = vld [vmem:[%s518_s3 + $0x10] sm:$0xff]  ;;  %v377_v15 = vld [vmem:[%s518_s3 + $0x8] sm:$0xff] }
   0x6   :  { %93 = vmatpush.bf16.msra.mxu0 %v374_v1  ;;  %v23_v13 = vld [vmem:[%s520_s0] sm:$0xf]  ;;  %v391_v17 = vld [vmem:[%s522_s5 + $0x38] sm:$0xff]  ;;  %v390_v18 = vld [vmem:[%s522_s5 + $0x30] sm:$0xff] }
   0x7   :  { %176 = vmatpush.bf16.msra.mxu1 %v382_v3  ;;  %v376_v16 = vld [vmem:[%s518_s3] sm:$0xff]  ;;  %254 = vmatpush.bf16.msra.mxu2 %v391_v17  ;;  %v389_v19 = vld [vmem:[%s522_s5 + $0x28] sm:$0xff]  ;;  %v387_v21 = vld [vmem:[%s522_s5 + $0x18] sm:$0xff] }
   0x8   :  { %v388_v20 = vld [vmem:[%s522_s5 + $0x20] sm:$0xff]  ;;  %v386_v28 = vld [vmem:[%s522_s5 + $0x10] sm:$0xff]  ;;  %v385_v29 = vld [vmem:[%s522_s5 + $0x8] sm:$0xff] }
   0x9   :  { %v392_v22 = vld [vmem:[%s519_s2] ss:$0 sm:$0xff] }
   0xa   :  { %94 = vmatpush.bf16.msra.mxu0 %v373_v4  ;;  %v384_v30 = vld [vmem:[%s522_s5] sm:$0xff] }
   0xb   :  { %177 = vmatpush.bf16.msra.mxu1 %v381_v5  ;;  %255 = vmatpush.bf16.msra.mxu2 %v390_v18  ;;  %v393_v31 = vld [vmem:[%s521_s4] ss:$0 sm:$0xff] }
   0xe   :  { %95 = vmatpush.bf16.msra.mxu0 %v372_v6 }
   0xf   :  { %178 = vmatpush.bf16.msra.mxu1 %v380_v7  ;;  %256 = vmatpush.bf16.msra.mxu2 %v389_v19 }
  0x12   :  { %96 = vmatpush.bf16.msra.mxu0 %v371_v8 }
  0x13   :  { %179 = vmatpush.bf16.msra.mxu1 %v379_v9  ;;  %257 = vmatpush.bf16.msra.mxu2 %v388_v20 }
  0x16   :  { %97 = vmatpush.bf16.msra.mxu0 %v370_v10 }
  0x17   :  { %180 = vmatpush.bf16.msra.mxu1 %v378_v14  ;;  %258 = vmatpush.bf16.msra.mxu2 %v387_v21 }
  0x1a   :  { %98 = vmatpush.bf16.msra.mxu0 %v369_v11 }
  0x1b   :  { %181 = vmatpush.bf16.msra.mxu1 %v377_v15  ;;  %259 = vmatpush.bf16.msra.mxu2 %v386_v28 }
  0x1e   :  { %99 = vmatpush.bf16.msra.mxu0 %v368_v12 }
  0x1f   :  { %182 = vmatpush.bf16.msra.mxu1 %v376_v16  ;;  %260 = vmatpush.bf16.msra.mxu2 %v385_v29 }
  0x21   :  { %100 = vmatmul.bf16.vlgmr.msra.gmra.mxu0 %v23_v13 }
  0x23   :  { %261 = vmatpush.bf16.msra.mxu2 %v384_v30 }
  0x9e   :  { %v101_v23 = vpop.f32.mrf.mxu0 }
  0x9f   :  { %v102_v24 = vadd.f32 %v392_v22, %v101_v23 }
  0xa1   :  { %394 = vtanh.f32 %v102_v24 }
  0xa6   :  { %v103_v25 = vpop.f32.mrf.mxu0 }
  0xa7   :  { %v395_v26 = vpop.eup %394 }
  0xa8   :  { %v106_v27 = vpack.c.bf16 %v395_v26, %v395_v26 }
  0xaa   :  { %183 = vmatmul.bf16.vlgmr.msra.gmra.mxu1 %v106_v27 }
 0x127   :  { %v184_v32 = vpop.f32.mrf.mxu1 }
 0x128   :  { %v185_v33 = vadd.f32 %v393_v31, %v184_v32 }
 0x12a   :  { %396 = vtanh.f32 %v185_v33 }
 0x12f   :  { %v186_v34 = vpop.f32.mrf.mxu1 }
 0x130   :  { %v397_v35 = vpop.eup %396 }
 0x131   :  { %v189_v36 = vpack.c.bf16 %v397_v35, %v397_v35 }
 0x133   :  { %262 = vmatmul.bf16.vlgmr.msra.gmra.mxu2 %v189_v36 }
 0x1b6   :  { %v263_v37 = vpop.f32.mrf.mxu2 }
 0x1b7   :  { %267 = vst [vmem:[%s523_s6] sm:$0xff] %v263_v37 }
 0x1be   :  { %v265_v38 = vpop.f32.mrf.mxu2 }

</bundles_post_ra>
